<compile_context>
chip_gen: v7x
topology: tpu7x:2x2x1
jax: 0.10.0
libtpu: 0.0.40
codegen_flags: <defaults>
</compile_context>

<pallas_src>
import jax
import jax.numpy as jnp
from jax.experimental import pallas as pl
from jax.experimental.pallas import tpu as pltpu

_MAX_TILE_ROWS = 1024   # (1024, 512) f32 block = 2 MiB per buffer
                        # -> <= 12 MiB live with 3 arrays x 2 pipeline buffers


def _div_tensor_kernel(x_ref, y_ref, o_ref):
    o_ref[...] = (x_ref[...] / y_ref[...]).astype(o_ref.dtype)


def _div_scalar_kernel(y_ref, x_ref, o_ref):
    # y_ref: (1,) float32 scalar living in SMEM; broadcast-divide the VMEM tile.
    o_ref[...] = (x_ref[...] / y_ref[0]).astype(o_ref.dtype)


def _choose_lane(total):
    """Pick a lane-dense width (multiple of 128) that divides `total` if possible."""
    for cand in (512, 256, 128):
        if total % cand == 0:
            return cand
    return 128  # ragged tail -> pad


def _flatten_lane_dense(a, rows, lane, pad_value):
    """Flatten `a` to (rows, lane), padding the ragged tail with pad_value."""
    flat = a.reshape(-1)
    pad = rows * lane - flat.shape[0]
    if pad:
        flat = jnp.concatenate(
            [flat, jnp.full((pad,), pad_value, dtype=flat.dtype)])
    return flat.reshape(rows, lane)


def eltwise_div(x, y):
    """Element-wise x / y with torch.Tensor.div semantics (true division)."""
    y_arr = jnp.asarray(y)
    out_dtype = jnp.result_type(x, y_arr)
    if not jnp.issubdtype(out_dtype, jnp.floating):
        out_dtype = jnp.float32     # torch.div on integers is true division

    orig_shape = x.shape
    total = x.size
    if total == 0:
        return jnp.zeros(orig_shape, out_dtype)

    lane = _choose_lane(total)
    rows = pl.cdiv(total, lane)
    tile_rows = min(_MAX_TILE_ROWS, rows)   # full-extent block if rows is small
    grid = (pl.cdiv(rows, tile_rows),)      # ragged row tail handled by masking

    x2 = _flatten_lane_dense(x.astype(out_dtype), rows, lane, 0)

    block = pl.BlockSpec((tile_rows, lane), lambda i: (i, 0))
    out_shape2 = jax.ShapeDtypeStruct((rows, lane), out_dtype)
    cparams = pltpu.CompilerParams(dimension_semantics=("parallel",))

    if jnp.ndim(y) == 0 or y_arr.size == 1:
        # Scalar divisor: keep it in SMEM; never materialize a broadcast.
        y_s = y_arr.reshape((1,)).astype(jnp.float32)
        out2 = pl.pallas_call(
            _div_scalar_kernel,
            out_shape=out_shape2,
            grid_spec=pl.GridSpec(
                grid=grid,
                in_specs=[
                    pl.BlockSpec(memory_space=pltpu.MemorySpace.SMEM),
                    block,
                ],
                out_specs=block,
            ),
            compiler_params=cparams,
        )(y_s, x2)
    else:
        # General tensor / broadcastable divisor.
        # TODO(synk): small broadcast divisors (e.g. per-channel (1,C,1,1)) are
        # materialized to full size here; a VMEM-resident broadcast-in-kernel
        # path would save that extra HBM traffic.
        y_full = jnp.broadcast_to(y_arr.astype(out_dtype), orig_shape)
        y2 = _flatten_lane_dense(y_full, rows, lane, 1)  # pad with 1: no 0/0 NaN
        out2 = pl.pallas_call(
            _div_tensor_kernel,
            out_shape=out_shape2,
            grid_spec=pl.GridSpec(
                grid=grid,
                in_specs=[block, block],
                out_specs=block,
            ),
            compiler_params=cparams,
        )(x2, y2)

    return out2.reshape(-1)[:total].reshape(orig_shape)


class EltwiseDiv:
    """JAX/Pallas port of distiller's EltwiseDiv module (no parameters)."""

    def __init__(self, inplace=False):
        # `inplace` has no meaning for functional JAX arrays; forward is pure.
        self.inplace = inplace

    def __call__(self, x, y):
        return eltwise_div(x, y)


if __name__ == "__main__":
    key = jax.random.PRNGKey(0)
    kx, ky = jax.random.split(key)

    # NCHW input, consistent with typical conv activations.
    x = jax.random.normal(kx, (2, 4, 16, 16), dtype=jnp.float32)
    # Divisor tensor of the same shape (kept away from zero).
    y = jax.random.uniform(ky, (2, 4, 16, 16), dtype=jnp.float32,
                           minval=0.5, maxval=2.0)

    mod = EltwiseDiv(inplace=False)

    # Tensor / tensor path.
    out = jax.block_until_ready(mod(x, y))
    ref = x / y
    assert out.shape == x.shape and out.dtype == ref.dtype
    assert jnp.allclose(out, ref, rtol=1e-6, atol=1e-6)

    # Scalar-divisor path (torch.Tensor.div(scalar)) -- SMEM scalar, no broadcast.
    out_s = jax.block_until_ready(mod(x, 2.0))
    assert jnp.allclose(out_s, x / 2.0, rtol=1e-6, atol=1e-6)

    # Broadcastable per-channel divisor (1, C, 1, 1).
    y_c = jnp.array([0.5, 1.0, 2.0, 4.0], dtype=jnp.float32).reshape(1, 4, 1, 1)
    out_c = jax.block_until_ready(mod(x, y_c))
    assert jnp.allclose(out_c, x / y_c, rtol=1e-6, atol=1e-6)

    print("KERNEL_OK")
</pallas_src>

<mosaic_0001>
module attributes {stable_mosaic.version = 11 : i64} {
  func.func @_div_tensor_kernel(%arg0: i32, %arg1: memref<4x512xf32, #tpu.memory_space<vmem>>, %arg2: memref<4x512xf32, #tpu.memory_space<vmem>>, %arg3: memref<4x512xf32, #tpu.memory_space<vmem>>) attributes {dimension_semantics = [#tpu.dimension_semantics<parallel>], iteration_bounds = array<i64: 1>, scalar_prefetch = 0 : i64, scratch_operands = 0 : i64, tpu.core_type = #tpu.core_type<tc>, window_params = [{transform_indices = @transform_0, window_bounds = array<i64: 4, 512>}, {transform_indices = @transform_1, window_bounds = array<i64: 4, 512>}, {transform_indices = @transform_2, window_bounds = array<i64: 4, 512>}]} {
    %c0 = arith.constant 0 : index
    %c0_0 = arith.constant 0 : index
    %0 = vector.load %arg1[%c0, %c0_0] : memref<4x512xf32, #tpu.memory_space<vmem>>, vector<4x512xf32>
    %c0_1 = arith.constant 0 : index
    %c0_2 = arith.constant 0 : index
    %1 = vector.load %arg2[%c0_1, %c0_2] : memref<4x512xf32, #tpu.memory_space<vmem>>, vector<4x512xf32>
    %2 = arith.divf %0, %1 : vector<4x512xf32>
    %c0_3 = arith.constant 0 : index
    %c0_4 = arith.constant 0 : index
    %3 = vector.load %arg3[%c0_3, %c0_4] : memref<4x512xf32, #tpu.memory_space<vmem>>, vector<4x512xf32>
    tpu.vector_store %arg3[%c0_3, %c0_4], %2 {strides = array<i32>} : memref<4x512xf32, #tpu.memory_space<vmem>>, vector<4x512xf32>,
    return
  }
  func.func @transform_0(%arg0: i32) -> (i32, i32) {
    %c0_i32 = arith.constant 0 : i32
    %c0_i32_0 = arith.constant 0 : i32
    return %arg0, %c0_i32 : i32, i32
  }
  func.func @transform_1(%arg0: i32) -> (i32, i32) {
    %c0_i32 = arith.constant 0 : i32
    %c0_i32_0 = arith.constant 0 : i32
    return %arg0, %c0_i32 : i32, i32
  }
  func.func @transform_2(%arg0: i32) -> (i32, i32) {
    %c0_i32 = arith.constant 0 : i32
    %c0_i32_0 = arith.constant 0 : i32
    return %arg0, %c0_i32 : i32, i32
  }
}

</mosaic_0001>

<bundles_post_ra>
// kernel: tpu_custom_call.1
= control target key start
LH: loop header
LB: loop body
LE: loop exit
PB: predicated region body
PF: predicated region fallthrough
CT: control target
= control target key end

     0   :  { %7 = vsyncpa [#allocation3], 0  ;;  %s195_s0 = inlined_call_operand.hbm [shape: f32[4,512], index: 0, kind: input, shape index: {}]   ;;  %s196_s1 = inlined_call_operand.hbm [shape: f32[4,512], index: 1, kind: input, shape index: {}]   ;;  %s197_s2 = inlined_call_operand.hbm [shape: f32[4,512], index: 2, kind: output, shape index: {}]  }
   0x1   :  { %8 = vsyncpa [#allocation6], 0 }
   0x2   :  { %9 = vsyncpa [#allocation4], 0  ;;  %s141_s9 = smov [#allocation2]   ;;  %s142_s11 = smov [#allocation5]  }
   0x3   :  { %s16_s10 = sshll.u32 %s141_s9, 4  ;;  %s26_s12 = sshll.u32 %s142_s11, 4  ;;  %s17_s10 = int_to_ptr.vmem [resolvable:$true] %s16_s10  ;;  %s27_s12 = int_to_ptr.vmem [resolvable:$true] %s26_s12 }
   0x4   :  { %s69_s15 = scalar_lea.hbm %s195_s0, 256 }
   0x5   :  { %p70_p0 = scmp.ne.s32.totalorder %s195_s0, %s69_s15  ;;  %p73_p1 = scmp.lt.u32.totalorder %s69_s15, %s195_s0 }
   0x7   :  { %p75_p2 = pnand %p73_p1, %p70_p0 }
   0x9   :  { %78 = shalt.err (!%p75_p2)
}
   0xa   :  { %s79_s20 = scalar_lea.vmem %s17_s10, 256  ;;  %p84_p4 = scmp.lt.s32.totalorder %s17_s10, %s17_s10 }
   0xb   :  { %p80_p3 = scmp.ne.s32.totalorder %s17_s10, %s79_s20  ;;  %p85_p5 = scmp.lt.s32.totalorder %s79_s20, %s79_s20 }
   0xd   :  { %p86_p6 = por %p85_p5, %p84_p4 }
   0xf   :  { %p87_p7 = pnand %p86_p6, %p80_p3 }
  0x11   :  { %90 = shalt.err (!%p87_p7)
}
  0x12   :  { %19 = dma.hbm_to_vmem [thread:$0]  %s195_s0, 256, %s17_s10, [#allocation3]  }
  0x13   :  { %s91_s25 = scalar_lea.hbm %s196_s1, 256 }
  0x14   :  { %p92_p8 = scmp.ne.s32.totalorder %s196_s1, %s91_s25  ;;  %p95_p9 = scmp.lt.u32.totalorder %s91_s25, %s196_s1 }
  0x16   :  { %p97_p10 = pnand %p95_p9, %p92_p8 }
  0x18   :  { %100 = shalt.err (!%p97_p10)
}
  0x19   :  { %s101_s30 = scalar_lea.vmem %s27_s12, 256  ;;  %p106_p12 = scmp.lt.s32.totalorder %s27_s12, %s27_s12 }
  0x1a   :  { %p102_p11 = scmp.ne.s32.totalorder %s27_s12, %s101_s30  ;;  %p107_p13 = scmp.lt.s32.totalorder %s101_s30, %s101_s30 }
  0x1c   :  { %p108_p0 = por %p107_p13, %p106_p12 }
  0x1e   :  { %p109_p1 = pnand %p108_p0, %p102_p11 }
  0x20   :  { %112 = shalt.err (!%p109_p1)
}
  0x21   :  { %29 = dma.hbm_to_vmem [thread:$0]  %s196_s1, 256, %s27_s12, [#allocation6]  }
  0x22   :  { %135 = dma.done.wait [#allocation3], 256  }
  0x23   :  { %136 = vsyncadd [#allocation3], 4294967040 }
  0x24   :  { %137 = dma.done.wait [#allocation6], 256  }
  0x25   :  { %138 = vsyncadd [#allocation6], 4294967040  ;;  %v38_v0 = vld [vmem:[#allocation5] sm:$0xff]  ;;  %v39_v1 = vld [vmem:[#allocation5 + $0x8] sm:$0xff]  ;;  %s143_s4 = smov [#allocation7]  }
  0x26   :  { %65 = vrcp.f32 %v38_v0  ;;  %v36_v2 = vld [vmem:[#allocation2] sm:$0xff]  ;;  %v37_v3 = vld [vmem:[#allocation2 + $0x8] sm:$0xff]  ;;  %s52_s5 = sshll.u32 %s143_s4, 4  ;;  %s53_s5 = int_to_ptr.vmem [resolvable:$true] %s52_s5 }
  0x27   :  { %67 = vrcp.f32 %v39_v1  ;;  %s113_s1 = scalar_lea.vmem %s53_s5, 256  ;;  %p118_p3 = scmp.lt.s32.totalorder %s53_s5, %s53_s5 }
  0x28   :  { %p114_p2 = scmp.ne.s32.totalorder %s53_s5, %s113_s1  ;;  %p119_p4 = scmp.lt.s32.totalorder %s113_s1, %s113_s1 }
  0x2a   :  { %p120_p5 = por %p119_p4, %p118_p3 }
  0x2c   :  { %p121_p6 = pnand %p120_p5, %p114_p2 }
  0x30   :  { %v66_v4 = vpop.eup %65 }
  0x31   :  { %v68_v5 = vpop.eup %67  ;;  %v41_v6 = vmul.f32 %v66_v4, %v36_v2 }
  0x32   :  { %v43_v7 = vmul.f32 %v68_v5, %v37_v3 }
  0x33   :  { %44 = vst [vmem:[#allocation7] sm:$0xff] %v41_v6 }
  0x34   :  { %45 = vst [vmem:[#allocation7 + $0x8] sm:$0xff] %v43_v7 }
  0x35   :  { %124 = shalt.err (!%p121_p6)
}
  0x36   :  { %s125_s8 = scalar_lea.hbm %s197_s2, 256 }
  0x37   :  { %p126_p7 = scmp.ne.s32.totalorder %s197_s2, %s125_s8  ;;  %p129_p8 = scmp.lt.u32.totalorder %s125_s8, %s197_s2 }
  0x39   :  { %p131_p9 = pnand %p129_p8, %p126_p7 }
  0x3b   :  { %134 = shalt.err (!%p131_p9)
}
  0x3c   :  { %55 = dma.vmem_to_hbm [thread:$0]  %s53_s5, 256, %s197_s2, [#allocation4]  }
  0x3d   :  { %139 = dma.done.wait [#allocation4], 256  }
  0x3e   :  { %140 = vsyncadd [#allocation4], 4294967040 }
  0x3f   :  { %59 = vsyncpa [#allocation3], 1 }
  0x40   :  { %60 = vsyncpa [#allocation6], 1 }
  0x41   :  { %61 = vsyncpa [#allocation4], 1 }

</bundles_post_ra>
